<compile_context>
chip_gen: v5e
topology: v5e:2x2
jax: 0.10.0
libtpu: 0.0.40
codegen_flags: <defaults>
</compile_context>

<pallas_src>
import jax
import jax.numpy as jnp
from jax import lax
from jax.experimental import pallas as pl
from jax.experimental.pallas import tpu as pltpu


def _round_up(x, m):
    return ((x + m - 1) // m) * m


def _vmem_capacity_bytes():
    """Per-generation VMEM capacity (v5e/v6e: 128 MiB, v7x: 64 MiB per TC)."""
    try:
        cap = int(pltpu.get_tpu_info().vmem_capacity_bytes)
        if cap > 0:
            return cap
    except Exception:
        pass
    return 64 * 1024 * 1024  # conservative fallback (v7x per-TensorCore VMEM)


def _pick_tile_b(B, L, H, h_itemsize, f_pad, vmem_limit):
    """Batch-tile rows: as big as the VMEM budget allows, but keep >= ~4 grid steps."""
    resident = 2 * H * 4 + H * f_pad * 4                    # q + w_h (f32), stay in VMEM
    per_row = 2 * (L * H * h_itemsize + f_pad * 4)          # double-buffered h row + out row
    budget = max(vmem_limit - resident - (4 << 20), 8 * per_row)   # headroom for scratch
    tile_cap = max(8, (budget // per_row) // 8 * 8)
    desired = max(8, _round_up(-(-B // 4), 8))              # >= ~4 steps when B allows
    return int(min(tile_cap, desired))


def _attention_pooling_kernel(h_ref, q_ref, wh_ref, out_ref):
    """Attention pooling over transformer layers for one batch tile.

    h_ref   : VMEM (TB, L, H)  native dtype (bf16 or f32) stacked CLS hidden states
    q_ref   : VMEM (1, H)  f32 attention query vector
    wh_ref  : VMEM (H, Fp) f32 projection weight (columns padded to 128)
    out_ref : VMEM (TB, Fp) f32 pooled + projected output
    """
    tb, L, H = h_ref.shape
    h = h_ref[...].astype(jnp.float32)                      # cast in VMEM, accumulate in f32

    # Layer scores on the MXU (keeps v6e/v7x off the XLU cross-lane-reduce path):
    # (TB*L, H) x (1, H) contracted over H -> (TB*L, 1). L % 8 == 0 (L = 24) makes the
    # reshapes layout-free; keeping scores as a (TB, L, 1) column avoids any relayout.
    s = lax.dot_general(
        h.reshape(tb * L, H), q_ref[...],
        dimension_numbers=(((1,), (1,)), ((), ())),
        preferred_element_type=jnp.float32,
        precision=lax.Precision.HIGHEST,
    ).reshape(tb, L, 1)

    # Numerically stable softmax over the layer (sublane) axis.
    m = jnp.max(s, axis=1, keepdims=True)                   # (TB, 1, 1)
    e = jnp.exp(s - m)                                      # (TB, L, 1)  (EUP)
    a = e * pl.reciprocal(jnp.sum(e, axis=1, keepdims=True), approx=True)

    # Attention-weighted pool over layers: lane-broadcast + sublane reduce -> (TB, H).
    pooled = jnp.sum(a * h, axis=1)

    # Projection on the MXU: (TB, H) @ (H, Fp) -> (TB, Fp), lane-dense store.
    out_ref[...] = jnp.dot(pooled, wh_ref[...],
                           preferred_element_type=jnp.float32,
                           precision=lax.Precision.HIGHEST)


def attention_pooling(all_hidden_states, q, w_h, *, num_layers=24, total_layers=25):
    """all_hidden_states: sequence of `total_layers` arrays [B, S, H] (any float dtype);
    q: [1, H]; w_h: [H, F].  Returns [B, F] float32."""
    # CLS token of the last `num_layers` layers, stacked -> (B, L, H), kept in the
    # hidden states' native dtype (no f32 upcast here: bf16 streams at half the bytes).
    # This touches only B*L*H elements (<= 1/S of the full hidden states), so the
    # stack is negligible HBM traffic; the old upcast + pad round-trips are gone.
    # TODO(synk): for very wide H the CLS rows could be DMA'd per-layer straight from
    # each hidden-state buffer (strided gather) instead of this small wrapper stack.
    h = jnp.stack(
        [all_hidden_states[i][:, 0, :]
         for i in range(total_layers - num_layers, total_layers)],
        axis=1,
    )
    B, L, H = h.shape

    q = q.reshape(1, H).astype(jnp.float32)
    w_h = w_h.astype(jnp.float32)
    F_out = w_h.shape[1]
    F_pad = _round_up(F_out, 128)                # keep the output lane-dense
    if F_pad != F_out:
        w_h = jnp.pad(w_h, ((0, 0), (0, F_pad - F_out)))

    vmem_limit = int(_vmem_capacity_bytes() * 3 // 4)   # ~96 MiB v5e/v6e, ~48 MiB v7x
    tile_b = _pick_tile_b(B, L, H, h.dtype.itemsize, F_pad, vmem_limit)
    grid_b = (B + tile_b - 1) // tile_b                 # cdiv; no jnp.pad round-trip

    out = pl.pallas_call(
        _attention_pooling_kernel,
        out_shape=jax.ShapeDtypeStruct((B, F_pad), jnp.float32),
        grid_spec=pltpu.PrefetchScalarGridSpec(
            num_scalar_prefetch=0,
            grid=(grid_b,),
            in_specs=[
                # h: the only streamed operand (native dtype). If xprof ever shows
                # exposed DMA, bump with pipeline_mode=pl.Buffered(3).
                pl.BlockSpec((tile_b, L, H), lambda i: (i, 0, 0)),
                pl.BlockSpec((1, H), lambda i: (0, 0)),              # q: resident
                pl.BlockSpec((H, F_pad), lambda i: (0, 0)),          # w_h: resident
            ],
            out_specs=pl.BlockSpec((tile_b, F_pad), lambda i: (i, 0)),
        ),
        compiler_params=pltpu.CompilerParams(
            dimension_semantics=("parallel",),                       # megacore on v7x
            vmem_limit_bytes=vmem_limit,
        ),
    )(h, q, w_h)

    return out[:, :F_out] if F_pad != F_out else out


def _attention_pooling_ref(all_hidden_states, q, w_h, *, num_layers, total_layers):
    """Pure-JAX reference mirroring the PyTorch forward (high-precision contractions)."""
    h = jnp.stack(
        [all_hidden_states[i][:, 0, :]
         for i in range(total_layers - num_layers, total_layers)],
        axis=1,
    ).astype(jnp.float32)                                   # (B, L, H)
    v = jnp.einsum("blh,h->bl", h, q.reshape(-1).astype(jnp.float32),
                   precision=lax.Precision.HIGHEST)
    v = jax.nn.softmax(v, axis=-1)
    pooled = jnp.einsum("bl,blh->bh", v, h, precision=lax.Precision.HIGHEST)
    return jnp.dot(pooled, w_h.astype(jnp.float32), precision=lax.Precision.HIGHEST)


if __name__ == "__main__":
    # Small shapes consistent with the module: 25 layers of [B, S, H] hidden states,
    # q: (1, H), w_h: (H, hiddendim_fc).
    B, SEQ, H, HID_FC = 2, 8, 128, 128
    NUM_LAYERS, TOTAL_LAYERS = 24, 25

    key = jax.random.PRNGKey(0)
    keys = jax.random.split(key, TOTAL_LAYERS + 2)

    all_hidden_states = tuple(
        jax.random.normal(keys[i], (B, SEQ, H), dtype=jnp.float32)
        for i in range(TOTAL_LAYERS)
    )
    q = 0.1 * jax.random.normal(keys[TOTAL_LAYERS], (1, H), dtype=jnp.float32)
    w_h = 0.1 * jax.random.normal(keys[TOTAL_LAYERS + 1], (H, HID_FC), dtype=jnp.float32)

    # f32 path (matches the PyTorch module's .float() semantics).
    out = attention_pooling(all_hidden_states, q, w_h,
                            num_layers=NUM_LAYERS, total_layers=TOTAL_LAYERS)
    out = jax.block_until_ready(out)
    ref = _attention_pooling_ref(all_hidden_states, q, w_h,
                                 num_layers=NUM_LAYERS, total_layers=TOTAL_LAYERS)

    assert out.shape == (B, HID_FC), out.shape
    assert out.dtype == jnp.float32
    assert bool(jnp.all(jnp.isfinite(out)))
    assert bool(jnp.allclose(out, ref, atol=1e-2, rtol=1e-2)), float(
        jnp.max(jnp.abs(out - ref)))

    # bf16 streaming path: h is DMA'd as bf16 (half the HBM bytes), cast to f32 in VMEM.
    hs_bf16 = tuple(x.astype(jnp.bfloat16) for x in all_hidden_states)
    out_bf16 = jax.block_until_ready(
        attention_pooling(hs_bf16, q, w_h,
                          num_layers=NUM_LAYERS, total_layers=TOTAL_LAYERS))
    ref_bf16 = _attention_pooling_ref(hs_bf16, q, w_h,
                                      num_layers=NUM_LAYERS, total_layers=TOTAL_LAYERS)
    assert out_bf16.shape == (B, HID_FC)
    assert bool(jnp.all(jnp.isfinite(out_bf16)))
    assert bool(jnp.allclose(out_bf16, ref_bf16, atol=2e-2, rtol=2e-2)), float(
        jnp.max(jnp.abs(out_bf16 - ref_bf16)))

    print("KERNEL_OK")
</pallas_src>

<mosaic_0001>
module attributes {stable_mosaic.version = 11 : i64} {
  func.func @_attention_pooling_kernel(%arg0: i32, %arg1: memref<8x24x128xf32, #tpu.memory_space<vmem>>, %arg2: memref<1x128xf32, #tpu.memory_space<vmem>>, %arg3: memref<128x128xf32, #tpu.memory_space<vmem>>, %arg4: memref<8x128xf32, #tpu.memory_space<vmem>>) attributes {dimension_semantics = [#tpu.dimension_semantics<parallel>], iteration_bounds = array<i64: 1>, scalar_prefetch = 0 : i64, scratch_operands = 0 : i64, tpu.core_type = #tpu.core_type<tc>, window_params = [{transform_indices = @transform_0, window_bounds = array<i64: 8, 24, 128>}, {pipeline_mode = #tpu.pipeline_mode<synchronous>, transform_indices = @transform_1, window_bounds = array<i64: 1, 128>}, {pipeline_mode = #tpu.pipeline_mode<synchronous>, transform_indices = @transform_2, window_bounds = array<i64: 128, 128>}, {transform_indices = @transform_3, window_bounds = array<i64: 8, 128>}]} {
    %c0 = arith.constant 0 : index
    %c0_0 = arith.constant 0 : index
    %c0_1 = arith.constant 0 : index
    %0 = vector.load %arg1[%c0, %c0_0, %c0_1] : memref<8x24x128xf32, #tpu.memory_space<vmem>>, vector<8x24x128xf32>
    %1 = vector.shape_cast %0 : vector<8x24x128xf32> to vector<192x128xf32>
    %c0_2 = arith.constant 0 : index
    %c0_3 = arith.constant 0 : index
    %2 = vector.load %arg2[%c0_2, %c0_3] : memref<1x128xf32, #tpu.memory_space<vmem>>, vector<1x128xf32>
    %cst = arith.constant dense<0.000000e+00> : vector<192x1xf32>
    %3 = tpu.matmul %1, %2, %cst {dimension_numbers = #tpu.dot_dimension_numbers<[1], [1], [0], [0], [0, 0, 1, 0], [], []>, precision = #tpu.contract_precision<fp32>} : vector<192x128xf32>, vector<1x128xf32>, vector<192x1xf32> -> vector<192x1xf32>
    %4 = vector.shape_cast %3 : vector<192x1xf32> to vector<8x24x1xf32>
    %cst_4 = arith.constant dense<0xFF800000> : vector<8x1xf32>
    %5 = vector.multi_reduction <maximumf>, %4, %cst_4 [1] : vector<8x24x1xf32> to vector<8x1xf32>
    %6 = vector.shape_cast %5 : vector<8x1xf32> to vector<8x1x1xf32>
    %7 = vector.broadcast %6 : vector<8x1x1xf32> to vector<8x24x1xf32>
    %8 = arith.subf %4, %7 : vector<8x24x1xf32>
    %9 = math.exp %8 : vector<8x24x1xf32>
    %cst_5 = arith.constant dense<0.000000e+00> : vector<8x1xf32>
    %10 = vector.multi_reduction <add>, %9, %cst_5 [1] : vector<8x24x1xf32> to vector<8x1xf32>
    %11 = vector.shape_cast %10 : vector<8x1xf32> to vector<8x1x1xf32>
    %12 = tpu.reciprocal %11 {approx = true} : vector<8x1x1xf32> -> vector<8x1x1xf32>
    %13 = vector.broadcast %12 : vector<8x1x1xf32> to vector<8x24x1xf32>
    %14 = arith.mulf %9, %13 : vector<8x24x1xf32>
    %15 = vector.broadcast %14 : vector<8x24x1xf32> to vector<8x24x128xf32>
    %16 = arith.mulf %15, %0 : vector<8x24x128xf32>
    %cst_6 = arith.constant dense<0.000000e+00> : vector<8x128xf32>
    %17 = vector.multi_reduction <add>, %16, %cst_6 [1] : vector<8x24x128xf32> to vector<8x128xf32>
    %c0_7 = arith.constant 0 : index
    %c0_8 = arith.constant 0 : index
    %18 = vector.load %arg3[%c0_7, %c0_8] : memref<128x128xf32, #tpu.memory_space<vmem>>, vector<128x128xf32>
    %cst_9 = arith.constant dense<0.000000e+00> : vector<8x128xf32>
    %19 = tpu.matmul %17, %18, %cst_9 {dimension_numbers = #tpu.dot_dimension_numbers<[1], [0], [0], [1], [0, 0, 1, 1], [], []>, precision = #tpu.contract_precision<fp32>} : vector<8x128xf32>, vector<128x128xf32>, vector<8x128xf32> -> vector<8x128xf32>
    %c0_10 = arith.constant 0 : index
    %c0_11 = arith.constant 0 : index
    %20 = vector.load %arg4[%c0_10, %c0_11] : memref<8x128xf32, #tpu.memory_space<vmem>>, vector<8x128xf32>
    tpu.vector_store %arg4[%c0_10, %c0_11], %19 {strides = array<i32>} : memref<8x128xf32, #tpu.memory_space<vmem>>, vector<8x128xf32>,
    return
  }
  func.func @transform_0(%arg0: i32) -> (i32, i32, i32) {
    %c0_i32 = arith.constant 0 : i32
    %c0_i32_0 = arith.constant 0 : i32
    %c0_i32_1 = arith.constant 0 : i32
    return %arg0, %c0_i32, %c0_i32_0 : i32, i32, i32
  }
  func.func @transform_1(%arg0: i32) -> (i32, i32) {
    %c0_i32 = arith.constant 0 : i32
    %c0_i32_0 = arith.constant 0 : i32
    %c0_i32_1 = arith.constant 0 : i32
    return %c0_i32, %c0_i32_0 : i32, i32
  }
  func.func @transform_2(%arg0: i32) -> (i32, i32) {
    %c0_i32 = arith.constant 0 : i32
    %c0_i32_0 = arith.constant 0 : i32
    %c0_i32_1 = arith.constant 0 : i32
    return %c0_i32, %c0_i32_0 : i32, i32
  }
  func.func @transform_3(%arg0: i32) -> (i32, i32) {
    %c0_i32 = arith.constant 0 : i32
    %c0_i32_0 = arith.constant 0 : i32
    return %arg0, %c0_i32 : i32, i32
  }
}

</mosaic_0001>

<bundles_post_ra>
// kernel: tpu_custom_call.1
= control target key start
LH: loop header
LB: loop body
LE: loop exit
PB: predicated region body
PF: predicated region fallthrough
CT: control target
= control target key end

     0   :  { %8 = vsyncpa [#allocation3], 0  ;;  %s1641_s0 = inlined_call_operand.hbm [shape: f32[2,24,128], index: 0, kind: input, shape index: {}]   ;;  %s1642_s1 = inlined_call_operand.hbm [shape: f32[1,128], index: 1, kind: input, shape index: {}]   ;;  %s1643_s2 = inlined_call_operand.hbm [shape: f32[128,128], index: 2, kind: input, shape index: {}]   ;;  %s1644_s3 = inlined_call_operand.hbm [shape: f32[2,128], index: 3, kind: output, shape index: {}]  }
   0x1   :  { %9 = vsyncpa [#allocation6], 0 }
   0x2   :  { %10 = vsyncpa [#allocation4], 0  ;;  %s29_s14 = sshll.u32 %s1642_s1, 4  ;;  %s30_s14 = int_to_ptr.hbm [resolvable:$true] %s29_s14 }
   0x3   :  { %14 = vsyncadd [#allocation3], 2304  ;;  %s1059_s15 = smov [#allocation5]   ;;  %s15_s19 = sshll.u32 %s1641_s0, 4  ;;  %s16_s19 = int_to_ptr.hbm [resolvable:$true] %s15_s19 }
   0x4   :  { %s31_s16 = sshll.u32 %s1059_s15, 4  ;;  %s1060_s20 = smov [#allocation2]   ;;  %s32_s16 = int_to_ptr.vmem [resolvable:$true] %s31_s16 }
   0x5   :  { %34 = dma.hbm_to_vmem [thread:$0]  %s30_s14, 16, %s32_s16, [#allocation6]  }
   0x6   :  { %s17_s21 = sshll.u32 %s1060_s20, 4  ;;  %s1061_s22 = smov 128   ;;  %s18_s21 = int_to_ptr.vmem [resolvable:$true] %s17_s21 }
   0x7   :  { %s1062_s23 = smov 8   ;;  %s39_s1 = sshll.u32 %s1643_s2, 4  ;;  %s40_s1 = int_to_ptr.hbm [resolvable:$true] %s39_s1 }
   0x8   :  { %23 = dma.hbm_to_vmem [thread:$0]  %s16_s19, 768, %s18_s21, [#allocation3], %s1061_s22, %s1061_s22, %s1062_s23  }
   0x9   :  { %s1063_s26 = smov [#allocation7]  }
   0xa   :  { %s41_s27 = sshll.u32 %s1063_s26, 4  ;;  %s42_s27 = int_to_ptr.vmem [resolvable:$true] %s41_s27 }
   0xb   :  { %47 = dma.hbm_to_vmem [thread:$0]  %s40_s1, 2048, %s42_s27, [#allocation6], %s1061_s22, %s1061_s22, %s1062_s23  }
   0xc   :  { %1053 = dma.done.wait [#allocation3], 3072  }
   0xd   :  { %1054 = vsyncadd [#allocation3], 4294964224 }
   0xe   :  { %1055 = dma.done.wait [#allocation6], 2064  }
   0xf   :  { %1056 = vsyncadd [#allocation6], 4294965232  ;;  %v1096_v0 = vld [vmem:[#allocation2 + $0x30] sm:$0xff]  ;;  %v1098_v1 = vld [vmem:[#allocation5] ss:$0 sm:$0xff]  ;;  %vm504_vm0 = vcmask 1041409  }
  0x10   :  { %v1100_v2 = vld [vmem:[#allocation2 + $0x18] sm:$0xff]  ;;  %v1102_v3 = vld [vmem:[#allocation2] sm:$0xff]  ;;  %v94_v4 = vmul.f32 %v1098_v1, %v1096_v0  ;;  %v1114_v9 = vld [vmem:[#allocation2 + $0x8] sm:$0xff]  ;;  %vm506_vm1 = vcmask 1042434   ;;  %vm508_vm2 = vcmask 1043459   ;;  %vm510_vm3 = vcmask 1044484  }
  0x11   :  { %v91_v5 = vmul.f32 %v1098_v1, %v1100_v2  ;;  %v88_v6 = vmul.f32 %v1098_v1, %v1102_v3  ;;  %v1110_v7 = vld [vmem:[#allocation2 + $0x38] sm:$0xff]  ;;  %v1112_v8 = vld [vmem:[#allocation2 + $0x20] sm:$0xff]  ;;  %v89_v12 = vmul.f32 %v1098_v1, %v1114_v9  ;;  %v1122_v13 = vld [vmem:[#allocation2 + $0x28] sm:$0xff]  ;;  %vm512_vm4 = vcmask 1045509  }
  0x12   :  { %124 = vadd.xlane.f32.xlu2 %v94_v4  ;;  %v95_v10 = vmul.f32 %v1098_v1, %v1110_v7  ;;  %v92_v11 = vmul.f32 %v1098_v1, %v1112_v8  ;;  %v1124_v14 = vld [vmem:[#allocation2 + $0x48] sm:$0xff]  ;;  %v1126_v15 = vld [vmem:[#allocation2 + $0x10] sm:$0xff]  ;;  %v93_v16 = vmul.f32 %v1098_v1, %v1122_v13  ;;  %v1134_v19 = vld [vmem:[#allocation2 + $0x40] sm:$0xff]  ;;  %vm514_vm5 = vcmask 1046534  }
  0x13   :  { %118 = vadd.xlane.f32.xlu1 %v91_v5  ;;  %112 = vadd.xlane.f32.xlu0 %v88_v6  ;;  %v97_v17 = vmul.f32 %v1098_v1, %v1124_v14  ;;  %v90_v18 = vmul.f32 %v1098_v1, %v1126_v15  ;;  %v1136_v20 = vld [vmem:[#allocation2 + $0x60] sm:$0xff]  ;;  %v1138_v21 = vld [vmem:[#allocation2 + $0x50] sm:$0xff]  ;;  %v96_v22 = vmul.f32 %v1098_v1, %v1134_v19  ;;  %v1146_v25 = vld [vmem:[#allocation2 + $0x58] sm:$0xff]  ;;  %vm516_vm6 = vcmask 1047559  }
  0x14   :  { %v100_v23 = vmul.f32 %v1098_v1, %v1136_v20  ;;  %v98_v24 = vmul.f32 %v1098_v1, %v1138_v21  ;;  %v1148_v26 = vld [vmem:[#allocation2 + $0x78] sm:$0xff]  ;;  %v1150_v27 = vld [vmem:[#allocation2 + $0x68] sm:$0xff]  ;;  %v99_v28 = vmul.f32 %v1098_v1, %v1146_v25  ;;  %v1158_v31 = vld [vmem:[#allocation2 + $0x70] sm:$0xff] }
  0x15   :  { %v103_v29 = vmul.f32 %v1098_v1, %v1148_v26  ;;  %v101_v30 = vmul.f32 %v1098_v1, %v1150_v27  ;;  %v1160_v32 = vld [vmem:[#allocation2 + $0x90] sm:$0xff]  ;;  %v1162_v33 = vld [vmem:[#allocation2 + $0x80] sm:$0xff]  ;;  %v102_v34 = vmul.f32 %v1098_v1, %v1158_v31  ;;  %v1170_v37 = vld [vmem:[#allocation2 + $0x88] sm:$0xff] }
  0x16   :  { %v106_v35 = vmul.f32 %v1098_v1, %v1160_v32  ;;  %v104_v36 = vmul.f32 %v1098_v1, %v1162_v33  ;;  %v81_v38 = vld [vmem:[#allocation2 + $0xa8] sm:$0xff]  ;;  %v1172_v39 = vld [vmem:[#allocation2 + $0x98] sm:$0xff]  ;;  %v105_v40 = vmul.f32 %v1098_v1, %v1170_v37  ;;  %v1179_v43 = vld [vmem:[#allocation2 + $0xa0] sm:$0xff] }
  0x17   :  { %v109_v41 = vmul.f32 %v1098_v1, %v81_v38  ;;  %v107_v42 = vmul.f32 %v1098_v1, %v1172_v39  ;;  %1657 = vst [vmem:[#allocation12_spill] sm:$0xff] %v1179_v43  ;;  %v83_v44 = vld [vmem:[#allocation2 + $0xb8] sm:$0xff]  ;;  %v82_v45 = vld [vmem:[#allocation2 + $0xb0] sm:$0xff]  ;;  %v108_v46 = vmul.f32 %v1098_v1, %v1179_v43 }
  0x18   :  { %v111_v47 = vmul.f32 %v1098_v1, %v83_v44  ;;  %v110_v48 = vmul.f32 %v1098_v1, %v82_v45 }
  0x1a   :  { %126 = vadd.xlane.f32.xlu2 %v95_v10 }
  0x1b   :  { %120 = vadd.xlane.f32.xlu1 %v92_v11  ;;  %114 = vadd.xlane.f32.xlu0 %v89_v12 }
  0x22   :  { %130 = vadd.xlane.f32.xlu2 %v97_v17 }
  0x23   :  { %122 = vadd.xlane.f32.xlu1 %v93_v16  ;;  %116 = vadd.xlane.f32.xlu0 %v90_v18 }
  0x2a   :  { %136 = vadd.xlane.f32.xlu2 %v100_v23 }
  0x2b   :  { %128 = vadd.xlane.f32.xlu1 %v96_v22  ;;  %132 = vadd.xlane.f32.xlu0 %v98_v24 }
  0x32   :  { %142 = vadd.xlane.f32.xlu2 %v103_v29 }
  0x33   :  { %134 = vadd.xlane.f32.xlu1 %v99_v28  ;;  %138 = vadd.xlane.f32.xlu0 %v101_v30 }
  0x3a   :  { %148 = vadd.xlane.f32.xlu2 %v106_v35 }
  0x3b   :  { %140 = vadd.xlane.f32.xlu1 %v102_v34  ;;  %144 = vadd.xlane.f32.xlu0 %v104_v36 }
  0x42   :  { %154 = vadd.xlane.f32.xlu2 %v109_v41 }
  0x43   :  { %146 = vadd.xlane.f32.xlu1 %v105_v40  ;;  %150 = vadd.xlane.f32.xlu0 %v107_v42 }
  0x4a   :  { %158 = vadd.xlane.f32.xlu2 %v111_v47 }
  0x4b   :  { %152 = vadd.xlane.f32.xlu1 %v108_v46  ;;  %156 = vadd.xlane.f32.xlu0 %v110_v48 }
  0x85   :  { %v1185_v49 = vpop.xlane.xlu2 %124 }
  0x86   :  { %v119_v50 = vpop.xlane.xlu1 %118  ;;  %v113_v51 = vpop.xlane.xlu0 %112 }
  0x8d   :  { %v1187_v52 = vpop.xlane.xlu2 %126 }
  0x8e   :  { %v121_v53 = vpop.xlane.xlu1 %120  ;;  %v115_v54 = vpop.xlane.xlu0 %114  ;;  %v176_v5 = vmax.f32 %v1185_v49, %v1187_v52 }
  0x8f   :  { %v168_v55 = vmax.f32 %v119_v50, %v121_v53  ;;  %v160_v56 = vmax.f32 %v113_v51, %v115_v54 }
  0x95   :  { %v1189_v58 = vpop.xlane.xlu2 %130 }
  0x96   :  { %v123_v57 = vpop.xlane.xlu1 %122  ;;  %v117_v60 = vpop.xlane.xlu0 %116 }
  0x97   :  { %v169_v59 = vmax.f32 %v168_v55, %v123_v57  ;;  %v161_v61 = vmax.f32 %v160_v56, %v117_v60 }
  0x99   :  { %v170_v62 = vrot.slane %v169_v59, 4  ;;  %v162_v63 = vrot.slane %v161_v61, 4 }
  0x9b   :  { %v171_v1 = vmax.f32 %v169_v59, %v170_v62  ;;  %v163_v4 = vmax.f32 %v161_v61, %v162_v63 }
  0x9d   :  { %v172_v6 = vrot.slane %v171_v1, 2  ;;  %v164_v10 = vrot.slane %v163_v4, 2  ;;  %v1193_v12 = vpop.xlane.xlu2 %136 }
  0x9e   :  { %v129_v11 = vpop.xlane.xlu1 %128  ;;  %v1195_v18 = vpop.xlane.xlu0 %132 }
  0x9f   :  { %v173_v16 = vmax.f32 %v171_v1, %v172_v6  ;;  %v177_v17 = vmax.f32 %v176_v5, %v129_v11  ;;  %v165_v22 = vmax.f32 %v163_v4, %v164_v10  ;;  %v184_v45 = vmax.f32 %v1189_v58, %v1195_v18 }
  0xa1   :  { %v174_v23 = vrot.slane %v173_v16, 1  ;;  %v178_v24 = vrot.slane %v177_v17, 4  ;;  %v166_v28 = vrot.slane %v165_v22, 1 }
  0xa3   :  { %v175_v29 = vmax.f32 %v173_v16, %v174_v23  ;;  %v179_v30 = vmax.f32 %v177_v17, %v178_v24  ;;  %v167_v34 = vmax.f32 %v165_v22, %v166_v28 }
  0xa5   :  { %v227_v35 = vsub.f32 %v119_v50, %v175_v29  ;;  %v228_v36 = vsub.f32 %v121_v53, %v175_v29  ;;  %v229_v38 = vsub.f32 %v123_v57, %v175_v29  ;;  %v180_v40 = vrot.slane %v179_v30, 2  ;;  %v1201_v47 = vpop.xlane.xlu2 %142 }
  0xa6   :  { %v224_v41 = vsub.f32 %v113_v51, %v167_v34  ;;  %v225_v42 = vsub.f32 %v115_v54, %v167_v34  ;;  %v226_v44 = vsub.f32 %v117_v60, %v167_v34  ;;  %v1199_v46 = vpop.xlane.xlu1 %134  ;;  %v1203_v61 = vpop.xlane.xlu0 %138 }
  0xa7   :  { %v254_v48 = vmul.f32 1.442695, %v227_v35  ;;  %v256_v55 = vmul.f32 1.442695, %v228_v36  ;;  %v258_v56 = vmul.f32 1.442695, %v229_v38  ;;  %v181_v59 = vmax.f32 %v179_v30, %v180_v40 }
  0xa8   :  { %v248_v50 = vmul.f32 1.442695, %v224_v41  ;;  %v185_v53 = vmax.f32 %v184_v45, %v1199_v46  ;;  %v250_v51 = vmul.f32 1.442695, %v225_v42  ;;  %v252_v60 = vmul.f32 1.442695, %v226_v44 }
  0xa9   :  { %890 = vpow2.f32 %v254_v48  ;;  %v182_v54 = vrot.slane %v181_v59, 1  ;;  %v192_v1 = vmax.f32 %v1193_v12, %v1203_v61 }
  0xaa   :  { %892 = vpow2.f32 %v256_v55  ;;  %v186_v57 = vrot.slane %v185_v53, 4 }
  0xab   :  { %894 = vpow2.f32 %v258_v56  ;;  %v183_v62 = vmax.f32 %v181_v59, %v182_v54 }
  0xac   :  { %896 = vpow2.f32 %v248_v50  ;;  %v187_v63 = vmax.f32 %v185_v53, %v186_v57 }
  0xad   :  { %898 = vpow2.f32 %v250_v51  ;;  %v230_v4 = vsub.f32 %v1185_v49, %v183_v62  ;;  %v231_v5 = vsub.f32 %v1187_v52, %v183_v62  ;;  %v232_v6 = vsub.f32 %v129_v11, %v183_v62  ;;  %v1212_v17 = vpop.xlane.xlu2 %148 }
  0xae   :  { %v188_v10 = vrot.slane %v187_v63, 2  ;;  %v1210_v16 = vpop.xlane.xlu1 %140  ;;  %900 = vpow2.f32 %v252_v60  ;;  %v1217_v29 = vpop.xlane.xlu0 %144 }
  0xaf   :  { %v1214_v22 = vpop.eup %890  ;;  %v260_v23 = vmul.f32 1.442695, %v230_v4  ;;  %v262_v24 = vmul.f32 1.442695, %v231_v5  ;;  %v193_v28 = vmax.f32 %v192_v1, %v1210_v16  ;;  %v264_v49 = vmul.f32 1.442695, %v232_v6 }
  0xb0   :  { %v1219_v30 = vpop.eup %892  ;;  %v189_v34 = vmax.f32 %v187_v63, %v188_v10  ;;  %v200_v59 = vmax.f32 %v1201_v47, %v1217_v29 }
  0xb1   :  { %v1221_v52 = vpop.eup %894  ;;  %v304_v11 = vadd.f32 %v1219_v30, %v1214_v22  ;;  %902 = vpow2.f32 %v260_v23  ;;  %v194_v35 = vrot.slane %v193_v28, 4 }
  0xb2   :  { %v1225_v36 = vpop.eup %896  ;;  %904 = vpow2.f32 %v262_v24  ;;  %v190_v38 = vrot.slane %v189_v34, 1 }
  0xb3   :  { %v1227_v40 = vpop.eup %898  ;;  %v305_v41 = vadd.f32 %v1221_v52, %v304_v11  ;;  %v195_v42 = vmax.f32 %v193_v28, %v194_v35  ;;  %906 = vpow2.f32 %v264_v49 }
  0xb4   :  { %v296_v44 = vadd.f32 %v1227_v40, %v1225_v36  ;;  %v191_v45 = vmax.f32 %v189_v34, %v190_v38  ;;  %v1232_v48 = vpop.eup %900 }
  0xb5   :  { %v306_v55 = vrot.slane %v305_v41, 4  ;;  %v196_v56 = vrot.slane %v195_v42, 2  ;;  %v1242_v60 = vpop.xlane.xlu2 %154 }
  0xb6   :  { %v297_v50 = vadd.f32 %v1232_v48, %v296_v44  ;;  %v233_v53 = vsub.f32 %v1189_v58, %v191_v45  ;;  %v234_v51 = vsub.f32 %v1195_v18, %v191_v45  ;;  %v235_v54 = vsub.f32 %v1199_v46, %v191_v45  ;;  %v1240_v57 = vpop.xlane.xlu1 %146  ;;  %v1247_v5 = vpop.xlane.xlu0 %150 }
  0xb7   :  { %v1244_v62 = vpop.eup %902  ;;  %v307_v63 = vadd.f32 %v306_v55, %v305_v41  ;;  %v197_v1 = vmax.f32 %v195_v42, %v196_v56  ;;  %v201_v4 = vmax.f32 %v200_v59, %v1240_v57  ;;  %v208_v45 = vmax.f32 %v1212_v17, %v1247_v5  ;;  %v495_v55 = vld [vmem:[#allocation7 + $0x78] sm:$0xff] }
  0xb8   :  { %v1249_v6 = vpop.eup %904  ;;  %v298_v10 = vrot.slane %v297_v50, 4  ;;  %v266_v58 = vmul.f32 1.442695, %v233_v53  ;;  %v268_v23 = vmul.f32 1.442695, %v234_v51 }
  0xb9   :  { %v308_v18 = vrot.slane %v307_v63, 2  ;;  %v312_v46 = vadd.f32 %v1249_v6, %v1244_v62  ;;  %v270_v24 = vmul.f32 1.442695, %v235_v54  ;;  %v198_v28 = vrot.slane %v197_v1, 1  ;;  %v1253_v49 = vpop.eup %906 }
  0xba   :  { %v299_v34 = vadd.f32 %v298_v10, %v297_v50  ;;  %908 = vpow2.f32 %v266_v58  ;;  %v202_v11 = vrot.slane %v201_v4, 4 }
  0xbb   :  { %v309_v35 = vadd.f32 %v308_v18, %v307_v63  ;;  %v313_v38 = vadd.f32 %v1253_v49, %v312_v46  ;;  %910 = vpow2.f32 %v268_v23  ;;  %v199_v41 = vmax.f32 %v197_v1, %v198_v28 }
  0xbc   :  { %v300_v42 = vrot.slane %v299_v34, 2  ;;  %912 = vpow2.f32 %v270_v24  ;;  %v203_v44 = vmax.f32 %v201_v4, %v202_v11  ;;  %v1263_v1 = vand.u32 4294901760, %v495_v55 }
  0xbd   :  { %v310_v56 = vrot.slane %v309_v35, 1  ;;  %v314_v59 = vrot.slane %v313_v38, 4  ;;  %v236_v53 = vsub.f32 %v1193_v12, %v199_v41  ;;  %v237_v50 = vsub.f32 %v1203_v61, %v199_v41 }
  0xbe   :  { %v301_v51 = vadd.f32 %v300_v42, %v299_v34  ;;  %v238_v54 = vsub.f32 %v1210_v16, %v199_v41  ;;  %v204_v63 = vrot.slane %v203_v44, 2  ;;  %v1261_v10 = vpop.xlane.xlu1 %152  ;;  %1658 = vst [vmem:[#allocation13_spill] sm:$0xff] %v1263_v1  ;;  %v1265_v46 = vpop.xlane.xlu0 %156  ;;  %520 = vmatpush.msra.mxu0 %v1263_v1  ;;  %716 = vmatpush.msra.mxu3 %v1263_v1 }
  0xbf   :  { %v311_v58 = vadd.f32 %v310_v56, %v309_v35  ;;  %v315_v4 = vadd.f32 %v314_v59, %v313_v38  ;;  %v272_v23 = vmul.f32 1.442695, %v236_v53  ;;  %v274_v18 = vmul.f32 1.442695, %v237_v50  ;;  %v1270_v34 = vpop.xlane.xlu2 %158 }
  0xc0   :  { %v1267_v24 = vpop.eup %908  ;;  %v302_v28 = vrot.slane %v301_v51, 1  ;;  %v276_v12 = vmul.f32 1.442695, %v238_v54  ;;  %v205_v11 = vmax.f32 %v203_v44, %v204_v63  ;;  %v209_v61 = vmax.f32 %v208_v45, %v1261_v10 }
  0xc1   :  { %v1274_v16 = vpop.eup %910  ;;  %914 = vrcp.f32 %v311_v58  ;;  %v316_v35 = vrot.slane %v315_v4, 2  ;;  %v216_v38 = vmax.f32 %v1242_v60, %v1265_v46  ;;  %v1279_v41 = vsub.f32 %v495_v55, %v1263_v1 }
  0xc2   :  { %v1281_v42 = vpop.eup %912  ;;  %v303_v44 = vadd.f32 %v302_v28, %v301_v51  ;;  %v320_v45 = vadd.f32 %v1274_v16, %v1267_v24  ;;  %916 = vpow2.f32 %v272_v23  ;;  %v206_v56 = vrot.slane %v205_v11, 1 }
  0xc3   :  { %v317_v59 = vadd.f32 %v316_v35, %v315_v4  ;;  %918 = vpow2.f32 %v274_v18  ;;  %v210_v53 = vrot.slane %v209_v61, 4  ;;  %v217_v50 = vmax.f32 %v216_v38, %v1270_v34  ;;  %663 = vmatpush.msra.mxu2 %v1279_v41 }
  0xc4   :  { %920 = vrcp.f32 %v303_v44  ;;  %v321_v54 = vadd.f32 %v1281_v42, %v320_v45  ;;  %v207_v55 = vmax.f32 %v205_v11, %v206_v56  ;;  %v562_v44 = vand.u32 4294901760, %v1279_v41 }
  0xc5   :  { %v318_v63 = vrot.slane %v317_v59, 1  ;;  %922 = vpow2.f32 %v276_v12  ;;  %v211_v58 = vmax.f32 %v209_v61, %v210_v53  ;;  %v218_v51 = vrot.slane %v217_v50, 4 }
  0xc6   :  { %v322_v28 = vrot.slane %v321_v54, 4  ;;  %v239_v1 = vsub.f32 %v1201_v47, %v207_v55  ;;  %v240_v23 = vsub.f32 %v1217_v29, %v207_v55  ;;  %v241_v4 = vsub.f32 %v1240_v57, %v207_v55 }
  0xc7   :  { %v915_v18 = vpop.eup %914  ;;  %v319_v35 = vadd.f32 %v318_v63, %v317_v59  ;;  %v212_v38 = vrot.slane %v211_v58, 2  ;;  %v1291_v43 = vmax.f32 %v217_v50, %v218_v51 }
  0xc8   :  { %v1294_v45 = vpop.eup %916  ;;  %v371_v12 = vmul.f32 %v915_v18, %v1214_v22  ;;  %v372_v11 = vmul.f32 %v915_v18, %v1219_v30  ;;  %v373_v61 = vmul.f32 %v915_v18, %v1221_v52  ;;  %v323_v47 = vadd.f32 %v322_v28, %v321_v54 }
  0xc9   :  { %v1299_v56 = vpop.eup %918  ;;  %924 = vrcp.f32 %v319_v35  ;;  %v278_v29 = vmul.f32 1.442695, %v239_v1  ;;  %v280_v57 = vmul.f32 1.442695, %v240_v23  ;;  %v282_v59 = vmul.f32 1.442695, %v241_v4 }
  0xca   :  { %v921_v53 = vpop.eup %920  ;;  %v395_v50 = vmul.f32 %v371_v12, %v1100_v2  ;;  %v396_v55 = vmul.f32 %v372_v11, %v1112_v8  ;;  %v397_v63 = vmul.f32 %v373_v61, %v1122_v13  ;;  %v324_v51 = vrot.slane %v323_v47, 2 }
  0xcb   :  { %v1304_v22 = vpop.eup %922  ;;  %v368_v30 = vmul.f32 %v921_v53, %v1225_v36  ;;  %v369_v52 = vmul.f32 %v921_v53, %v1227_v40  ;;  %v370_v54 = vmul.f32 %v921_v53, %v1232_v48  ;;  %v328_v1 = vadd.f32 %v1299_v56, %v1294_v45 }
  0xcc   :  { %v424_v28 = vadd.f32 %v396_v55, %v395_v50  ;;  %v325_v23 = vadd.f32 %v324_v51, %v323_v47  ;;  %926 = vpow2.f32 %v278_v29  ;;  %v213_v2 = vmax.f32 %v211_v58, %v212_v38 }
  0xcd   :  { %v392_v8 = vmul.f32 %v368_v30, %v1102_v3  ;;  %v393_v13 = vmul.f32 %v369_v52, %v1114_v9  ;;  %v394_v4 = vmul.f32 %v370_v54, %v1126_v15  ;;  %v329_v18 = vadd.f32 %v1304_v22, %v328_v1 }
  0xce   :  { %v425_v36 = vadd.f32 %v424_v28, %v397_v63  ;;  %v326_v35 = vrot.slane %v325_v23, 1  ;;  %928 = vpow2.f32 %v280_v57  ;;  %v214_v40 = vrot.slane %v213_v2, 1 }
  0xcf   :  { %v925_v48 = vpop.eup %924  ;;  %v416_v12 = vadd.f32 %v393_v13, %v392_v8  ;;  %v330_v11 = vrot.slane %v329_v18, 4  ;;  %930 = vpow2.f32 %v282_v59  ;;  %v220_v61 = vrot.slane %v1291_v43, 2 }
  0xd0   :  { %v426_v47 = vrot.slane %v425_v36, 4  ;;  %v374_v58 = vmul.f32 %v925_v48, %v1244_v62  ;;  %v375_v3 = vmul.f32 %v925_v48, %v1249_v6  ;;  %v376_v9 = vmul.f32 %v925_v48, %v1253_v49 }
  0xd1   :  { %v417_v15 = vadd.f32 %v416_v12, %v394_v4  ;;  %v327_v38 = vadd.f32 %v326_v35, %v325_v23  ;;  %v331_v29 = vadd.f32 %v330_v11, %v329_v18  ;;  %v215_v53 = vmax.f32 %v213_v2, %v214_v40 }
  0xd2   :  { %v1319_v50 = vpop.eup %926  ;;  %v427_v57 = vadd.f32 %v426_v47, %v425_v36  ;;  %v398_v55 = vmul.f32 %v374_v58, %v1096_v0  ;;  %v399_v59 = vmul.f32 %v375_v3, %v1110_v7  ;;  %v400_v63 = vmul.f32 %v376_v9, %v1134_v19  ;;  %v494_v9 = vld [vmem:[#allocation7 + $0x70] sm:$0xff] }
  0xd3   :  { %v418_v51 = vrot.slane %v417_v15, 4  ;;  %932 = vrcp.f32 %v327_v38  ;;  %v332_v62 = vrot.slane %v331_v29, 2  ;;  %v242_v6 = vsub.f32 %v1212_v17, %v215_v53 }
  0xd4   :  { %v1325_v30 = vpop.eup %928  ;;  %v428_v49 = vrot.slane %v427_v57, 2  ;;  %v432_v52 = vadd.f32 %v399_v59, %v398_v55  ;;  %v243_v54 = vsub.f32 %v1247_v5, %v215_v53  ;;  %v244_v1 = vsub.f32 %v1261_v10, %v215_v53 }
  0xd5   :  { %v1329_v28 = vpop.eup %930  ;;  %v419_v0 = vadd.f32 %v418_v51, %v417_v15  ;;  %v333_v23 = vadd.f32 %v332_v62, %v331_v29  ;;  %v336_v7 = vadd.f32 %v1325_v30, %v1319_v50  ;;  %v284_v19 = vmul.f32 1.442695, %v242_v6 }
  0xd6   :  { %v433_v2 = vadd.f32 %v432_v52, %v400_v63  ;;  %v286_v8 = vmul.f32 1.442695, %v243_v54  ;;  %v288_v13 = vmul.f32 1.442695, %v244_v1  ;;  %v221_v5 = vmax.f32 %v1291_v43, %v220_v61 }
  0xd7   :  { %v420_v17 = vrot.slane %v419_v0, 2  ;;  %v334_v4 = vrot.slane %v333_v23, 1  ;;  %v337_v18 = vadd.f32 %v1329_v28, %v336_v7  ;;  %934 = vpow2.f32 %v284_v19 }
  0xd8   :  { %936 = vpow2.f32 %v286_v8  ;;  %v429_v36 = vadd.f32 %v428_v49, %v427_v57  ;;  %v434_v35 = vrot.slane %v433_v2, 4  ;;  %v563_v48 = vsub.f32 %v1279_v41, %v562_v44  ;;  %v493_v57 = vld [vmem:[#allocation7 + $0x68] sm:$0xff]  ;;  %v492_v49 = vld [vmem:[#allocation7 + $0x60] sm:$0xff]  ;;  %v956_v41 = vld [vmem:[#allocation2 + $0xb8] sm:$0xff] }
  0xd9   :  { %v933_v10 = vpop.eup %932  ;;  %v338_v40 = vrot.slane %v337_v18, 4  ;;  %938 = vpow2.f32 %v288_v13  ;;  %v421_v47 = vadd.f32 %v420_v17, %v419_v0  ;;  %v335_v58 = vadd.f32 %v334_v4, %v333_v23 }
  0xda   :  { %v377_v12 = vmul.f32 %v933_v10, %v1267_v24  ;;  %v378_v11 = vmul.f32 %v933_v10, %v1274_v16  ;;  %v222_v15 = vrot.slane %v221_v5, 1  ;;  %v430_v43 = vrot.slane %v429_v36, 1 }
  0xdb   :  { %v339_v3 = vadd.f32 %v338_v40, %v337_v18  ;;  %v435_v61 = vadd.f32 %v434_v35, %v433_v2  ;;  %v564_v53 = vand.u32 4294901760, %v563_v48  ;;  %v1346_v63 = vand.u32 4294901760, %v494_v9 }
  0xdc   :  { %v401_v59 = vmul.f32 %v377_v12, %v1124_v14  ;;  %v402_v24 = vmul.f32 %v378_v11, %v1138_v21  ;;  %v223_v16 = vmax.f32 %v221_v5, %v222_v15  ;;  %v422_v51 = vrot.slane %v421_v47, 1  ;;  %v491_v12 = vld [vmem:[#allocation7 + $0x58] sm:$0xff] }
  0xdd   :  { %v1340_v38 = vpop.eup %934  ;;  %v340_v29 = vrot.slane %v339_v3, 2  ;;  %940 = vrcp.f32 %v335_v58  ;;  %565 = vmatpush.msra.mxu1 %v564_v53  ;;  %v379_v54 = vmul.f32 %v933_v10, %v1281_v42  ;;  %v1355_v21 = vand.u32 4294901760, %v493_v57  ;;  %522 = vmatpush.msra.mxu0 %v1346_v63 }
  0xde   :  { %v1342_v55 = vpop.eup %936  ;;  %v245_v1 = vsub.f32 %v1242_v60, %v223_v16  ;;  %v246_v14 = vsub.f32 %v1265_v46, %v223_v16  ;;  %718 = vmatpush.msra.mxu3 %v1346_v63  ;;  %v247_v7 = vsub.f32 %v1270_v34, %v223_v16  ;;  %v1362_v19 = vsub.f32 %v494_v9, %v1346_v63 }
  0xdf   :  { %v341_v62 = vadd.f32 %v340_v29, %v339_v3  ;;  %v344_v6 = vadd.f32 %v1342_v55, %v1340_v38  ;;  %v1350_v52 = vpop.eup %938  ;;  %v436_v2 = vrot.slane %v435_v61, 2  ;;  %v440_v42 = vadd.f32 %v402_v24, %v401_v59  ;;  %524 = vmatpush.msra.mxu0 %v1355_v21 }
  0xe0   :  { %v1364_v8 = vand.u32 4294901760, %v492_v49  ;;  %720 = vmatpush.msra.mxu3 %v1355_v21  ;;  %v290_v13 = vmul.f32 1.442695, %v245_v1  ;;  %666 = vmatpush.msra.mxu2 %v1362_v19  ;;  %v1369_v17 = vadd.f32 %v430_v43, %v429_v36  ;;  %v403_v34 = vmul.f32 %v379_v54, %v1146_v25 }
  0xe1   :  { %v342_v0 = vrot.slane %v341_v62, 1  ;;  %v345_v23 = vadd.f32 %v1350_v52, %v344_v6  ;;  %v292_v4 = vmul.f32 1.442695, %v246_v14  ;;  %v1374_v5 = vadd.f32 %v422_v51, %v421_v47  ;;  %v490_v47 = vld [vmem:[#allocation7 + $0x50] sm:$0xff] }
  0xe2   :  { %526 = vmatpush.msra.mxu0 %v1364_v8  ;;  %722 = vmatpush.msra.mxu3 %v1364_v8  ;;  %v294_v35 = vmul.f32 1.442695, %v247_v7  ;;  %v1376_v40 = vadd.f32 %v436_v2, %v435_v61  ;;  %v441_v48 = vadd.f32 %v440_v42, %v403_v34  ;;  %v568_v36 = vand.u32 4294901760, %v1362_v19  ;;  %v487_v34 = vld [vmem:[#allocation7 + $0x38] sm:$0xff] }
  0xe3   :  { %v343_v60 = vadd.f32 %v342_v0, %v341_v62  ;;  %v346_v46 = vrot.slane %v345_v23, 4  ;;  %v941_v18 = vpop.eup %940  ;;  %v1380_v25 = vsub.f32 %v493_v57, %v1355_v21  ;;  %v1383_v58 = vsub.f32 %v492_v49, %v1364_v8 }
  0xe4   :  { %v380_v3 = vmul.f32 %v941_v18, %v1294_v45  ;;  %v381_v9 = vmul.f32 %v941_v18, %v1299_v56  ;;  %v569_v15 = vsub.f32 %v1362_v19, %v568_v36  ;;  %v1392_v53 = vand.u32 4294901760, %v491_v12 }
  0xe5   :  { %942 = vrcp.f32 %v343_v60  ;;  %v347_v10 = vadd.f32 %v346_v46, %v345_v23  ;;  %v574_v61 = vand.u32 4294901760, %v1380_v25  ;;  %v580_v29 = vand.u32 4294901760, %v1383_v58  ;;  %669 = vmatpush.msra.mxu2 %v1380_v25  ;;  %v489_v46 = vld [vmem:[#allocation7 + $0x48] sm:$0xff] }
  0xe6   :  { %944 = vpow2.f32 %v290_v13  ;;  %v438_v57 = vrot.slane %v1376_v40, 1  ;;  %v442_v59 = vrot.slane %v441_v48, 4  ;;  %v570_v45 = vand.u32 4294901760, %v569_v15  ;;  %528 = vmatpush.msra.mxu0 %v1392_v53  ;;  %724 = vmatpush.msra.mxu3 %v1392_v53 }
  0xe7   :  { %v348_v11 = vrot.slane %v347_v10, 2  ;;  %946 = vpow2.f32 %v292_v4  ;;  %v1396_v24 = vand.u32 4294901760, %v490_v47  ;;  %v575_v51 = vsub.f32 %v1380_v25, %v574_v61  ;;  %672 = vmatpush.msra.mxu2 %v1383_v58 }
  0xe8   :  { %948 = vpow2.f32 %v294_v35  ;;  %v581_v62 = vsub.f32 %v1383_v58, %v580_v29  ;;  %v1405_v6 = vsub.f32 %v491_v12, %v1392_v53  ;;  %v404_v54 = vmul.f32 %v380_v3, %v1136_v20  ;;  %571 = vmatpush.msra.mxu1 %v570_v45 }
  0xe9   :  { %v349_v43 = vadd.f32 %v348_v11, %v347_v10  ;;  %v405_v1 = vmul.f32 %v381_v9, %v1150_v27  ;;  %v382_v7 = vmul.f32 %v941_v18, %v1304_v22  ;;  %v576_v42 = vand.u32 4294901760, %v575_v51  ;;  %530 = vmatpush.msra.mxu0 %v1396_v24  ;;  %v488_v22 = vld [vmem:[#allocation7 + $0x40] sm:$0xff]  ;;  %726 = vmatpush.msra.mxu3 %v1396_v24 }
  0xea   :  { %v582_v60 = vand.u32 4294901760, %v581_v62  ;;  %675 = vmatpush.msra.mxu2 %v1405_v6  ;;  %v1428_v4 = vadd.f32 %v442_v59, %v441_v48  ;;  %v586_v18 = vand.u32 4294901760, %v1405_v6  ;;  %v1432_v10 = vsub.f32 %v490_v47, %v1396_v24  ;;  %v486_v59 = vld [vmem:[#allocation7 + $0x30] sm:$0xff] }
  0xeb   :  { %v943_v56 = vpop.eup %942  ;;  %v350_v16 = vrot.slane %v349_v43, 1  ;;  %577 = vmatpush.msra.mxu1 %v576_v42  ;;  %v1435_v35 = vand.u32 4294901760, %v489_v46  ;;  %v1442_v11 = vand.u32 4294901760, %v488_v22  ;;  %v1444_v3 = vand.u32 4294901760, %v487_v34 }
  0xec   :  { %v1409_v49 = vpop.eup %944  ;;  %v383_v14 = vmul.f32 %v943_v56, %v1319_v50  ;;  %v384_v0 = vmul.f32 %v943_v56, %v1325_v30  ;;  %v385_v27 = vmul.f32 %v943_v56, %v1329_v28  ;;  %v448_v28 = vadd.f32 %v405_v1, %v404_v54  ;;  %678 = vmatpush.msra.mxu2 %v1432_v10 }
  0xed   :  { %v1415_v23 = vpop.eup %946  ;;  %v351_v2 = vadd.f32 %v350_v16, %v349_v43  ;;  %583 = vmatpush.msra.mxu1 %v582_v60  ;;  %v587_v48 = vsub.f32 %v1405_v6, %v586_v18  ;;  %v592_v12 = vand.u32 4294901760, %v1432_v10  ;;  %v406_v47 = vmul.f32 %v382_v7, %v1158_v31  ;;  %532 = vmatpush.msra.mxu0 %v1435_v35 }
  0xee   :  { %v1420_v20 = vpop.eup %948  ;;  %v407_v50 = vmul.f32 %v383_v14, %v1148_v26  ;;  %v408_v30 = vmul.f32 %v384_v0, %v1162_v33  ;;  %v352_v13 = vadd.f32 %v1415_v23, %v1409_v49  ;;  %v409_v9 = vmul.f32 %v385_v27, %v1170_v37  ;;  %728 = vmatpush.msra.mxu3 %v1435_v35  ;;  %v485_v37 = vld [vmem:[#allocation7 + $0x28] sm:$0xff] }
  0xef   :  { %950 = vrcp.f32 %v351_v2  ;;  %v1450_v43 = vsub.f32 %v489_v46, %v1435_v35  ;;  %v588_v45 = vand.u32 4294901760, %v587_v48  ;;  %v593_v56 = vsub.f32 %v1432_v10, %v592_v12  ;;  %534 = vmatpush.msra.mxu0 %v1442_v11  ;;  %v482_v48 = vld [vmem:[#allocation7 + $0x10] sm:$0xff] }
  0xf0   :  { %v456_v26 = vadd.f32 %v408_v30, %v407_v50  ;;  %v353_v33 = vadd.f32 %v1420_v20, %v352_v13  ;;  %v1458_v16 = vsub.f32 %v488_v22, %v1442_v11  ;;  %v1461_v31 = vsub.f32 %v487_v34, %v1444_v3  ;;  %730 = vmatpush.msra.mxu3 %v1442_v11 }
  0xf1   :  { %v1463_v51 = vadd.f32 %v448_v28, %v406_v47  ;;  %v1656_v1 = vand.u32 4294901760, %v1450_v43  ;;  %681 = vmatpush.msra.mxu2 %v1450_v43  ;;  %589 = vmatpush.msra.mxu1 %v588_v45  ;;  %v594_v0 = vand.u32 4294901760, %v593_v56  ;;  %v1472_v42 = vand.u32 4294901760, %v486_v59  ;;  %v1659_v47 = vld [vmem:[#allocation12_spill] sm:$0xff] }
  0xf2   :  { %v354_v15 = vrot.slane %v353_v33, 4  ;;  %v1465_v62 = vadd.f32 %v456_v26, %v409_v9  ;;  %v1650_v7 = vand.u32 4294901760, %v1458_v16  ;;  %v1647_v2 = vand.u32 4294901760, %v1461_v31  ;;  %536 = vmatpush.msra.mxu0 %v1444_v3  ;;  %v484_v26 = vld [vmem:[#allocation7 + $0x20] sm:$0xff]  ;;  %732 = vmatpush.msra.mxu3 %v1444_v3 }
  0xf3   :  { %v1478_v50 = vand.u32 4294901760, %v485_v37  ;;  %595 = vmatpush.msra.mxu1 %v594_v0  ;;  %v599_v13 = vsub.f32 %v1450_v43, %v1656_v1  ;;  %684 = vmatpush.msra.mxu2 %v1458_v16 }
  0xf4   :  { %v355_v54 = vadd.f32 %v354_v15, %v353_v33  ;;  %v605_v22 = vsub.f32 %v1458_v16, %v1650_v7  ;;  %v483_v33 = vld [vmem:[#allocation7 + $0x18] sm:$0xff]  ;;  %538 = vmatpush.msra.mxu0 %v1472_v42  ;;  %734 = vmatpush.msra.mxu3 %v1472_v42 }
  0xf5   :  { %v951_v14 = vpop.eup %950  ;;  %v600_v45 = vand.u32 4294901760, %v599_v13  ;;  %687 = vmatpush.msra.mxu2 %v1461_v31 }
  0xf6   :  { %v386_v60 = vmul.f32 %v951_v14, %v1340_v38  ;;  %v387_v46 = vmul.f32 %v951_v14, %v1342_v55  ;;  %v388_v27 = vmul.f32 %v951_v14, %v1350_v52  ;;  %v356_v30 = vrot.slane %v355_v54, 2  ;;  %v481_v14 = vld [vmem:[#allocation7 + $0x8] sm:$0xff]  ;;  %540 = vmatpush.msra.mxu0 %v1478_v50  ;;  %736 = vmatpush.msra.mxu3 %v1478_v50 }
  0xf7   :  { %v611_v38 = vsub.f32 %v1461_v31, %v1647_v2  ;;  %v450_v55 = vrot.slane %v1463_v51, 4  ;;  %v458_v52 = vrot.slane %v1465_v62, 4  ;;  %v606_v56 = vand.u32 4294901760, %v605_v22  ;;  %601 = vmatpush.msra.mxu1 %v600_v45 }
  0xf8   :  { %v410_v34 = vmul.f32 %v386_v60, %v1160_v32  ;;  %v411_v28 = vmul.f32 %v387_v46, %v1172_v39  ;;  %v412_v9 = vmul.f32 %v388_v27, %v1659_v47  ;;  %v357_v15 = vadd.f32 %v356_v30, %v355_v54 }
  0xf9   :  { %v612_v2 = vand.u32 4294901760, %v611_v38  ;;  %v1500_v32 = vsub.f32 %v486_v59, %v1472_v42  ;;  %v1503_v39 = vsub.f32 %v485_v37, %v1478_v50  ;;  %v1506_v46 = vand.u32 4294901760, %v484_v26  ;;  %607 = vmatpush.msra.mxu1 %v606_v56 }
  0xfa   :  { %v464_v0 = vadd.f32 %v411_v28, %v410_v34  ;;  %v358_v60 = vrot.slane %v357_v15, 1  ;;  %v1508_v54 = vand.u32 4294901760, %v483_v33  ;;  %v1510_v27 = vand.u32 4294901760, %v482_v48 }
  0xfb   :  { %v1649_v13 = vand.u32 4294901760, %v1500_v32  ;;  %v1648_v59 = vand.u32 4294901760, %v1503_v39  ;;  %v1515_v22 = vand.u32 4294901760, %v481_v14  ;;  %690 = vmatpush.msra.mxu2 %v1500_v32  ;;  %v1519_v38 = vsub.f32 %v484_v26, %v1506_v46  ;;  %542 = vmatpush.msra.mxu0 %v1506_v46  ;;  %v480_v26 = vld [vmem:[#allocation7] sm:$0xff] }
  0xfc   :  { %v465_v30 = vadd.f32 %v464_v0, %v412_v9  ;;  %v359_v37 = vadd.f32 %v358_v60, %v357_v15  ;;  %v1522_v34 = vsub.f32 %v483_v33, %v1508_v54  ;;  %v1525_v28 = vsub.f32 %v482_v48, %v1510_v27  ;;  %613 = vmatpush.msra.mxu1 %v612_v2 }
  0xfd   :  { %v617_v9 = vsub.f32 %v1500_v32, %v1649_v13  ;;  %v623_v45 = vsub.f32 %v1503_v39, %v1648_v59  ;;  %v1534_v15 = vsub.f32 %v481_v14, %v1515_v22  ;;  %693 = vmatpush.msra.mxu2 %v1503_v39  ;;  %v1654_v33 = vand.u32 4294901760, %v1519_v38  ;;  %544 = vmatpush.msra.mxu0 %v1508_v54 }
  0xfe   :  { %v466_v47 = vrot.slane %v465_v30, 4  ;;  %952 = vrcp.f32 %v359_v37  ;;  %v1651_v48 = vand.u32 4294901760, %v1522_v34  ;;  %v1653_v56 = vand.u32 4294901760, %v1525_v28  ;;  %738 = vmatpush.msra.mxu3 %v1506_v46 }
  0xff   :  { %v451_v0 = vadd.f32 %v450_v55, %v1463_v51  ;;  %v618_v60 = vand.u32 4294901760, %v617_v9  ;;  %v624_v14 = vand.u32 4294901760, %v623_v45  ;;  %v1652_v59 = vand.u32 4294901760, %v1534_v15  ;;  %696 = vmatpush.msra.mxu2 %v1519_v38  ;;  %546 = vmatpush.msra.mxu0 %v1510_v27 }
 0x100   :  { %v459_v2 = vadd.f32 %v458_v52, %v1465_v62  ;;  %v629_v37 = vsub.f32 %v1519_v38, %v1654_v33  ;;  %v635_v13 = vsub.f32 %v1522_v34, %v1651_v48  ;;  %v1553_v7 = vand.u32 4294901760, %v480_v26  ;;  %740 = vmatpush.msra.mxu3 %v1508_v54 }
 0x101   :  { %v439_v51 = vadd.f32 %v438_v57, %v1376_v40  ;;  %619 = vmatpush.msra.mxu1 %v618_v60  ;;  %v641_v62 = vsub.f32 %v1525_v28, %v1653_v56  ;;  %v444_v55 = vrot.slane %v1428_v4, 2  ;;  %v467_v52 = vadd.f32 %v466_v47, %v465_v30  ;;  %699 = vmatpush.msra.mxu2 %v1522_v34 }
 0x102   :  { %v630_v9 = vand.u32 4294901760, %v629_v37  ;;  %v1565_v45 = vsub.f32 %v480_v26, %v1553_v7  ;;  %v452_v48 = vrot.slane %v451_v0, 2  ;;  %v636_v40 = vand.u32 4294901760, %v635_v13  ;;  %548 = vmatpush.msra.mxu0 %v1515_v22  ;;  %742 = vmatpush.msra.mxu3 %v1510_v27 }
 0x103   :  { %625 = vmatpush.msra.mxu1 %v624_v14  ;;  %v647_v57 = vsub.f32 %v1534_v15, %v1652_v59  ;;  %v460_v30 = vrot.slane %v459_v2, 2  ;;  %702 = vmatpush.msra.mxu2 %v1525_v28  ;;  %v505_v26 = vsel %vm504_vm0, %v1369_v17, %v1374_v5  ;;  %v642_v59 = vand.u32 4294901760, %v641_v62 }
 0x104   :  { %v953_v60 = vpop.eup %952  ;;  %v1655_v47 = vand.u32 4294901760, %v1565_v45  ;;  %550 = vmatpush.msra.mxu0 %v1553_v7  ;;  %v468_v56 = vrot.slane %v467_v52, 2  ;;  %v507_v17 = vsel %vm506_vm1, %v439_v51, %v505_v26  ;;  %v445_v5 = vadd.f32 %v444_v55, %v1428_v4  ;;  %744 = vmatpush.msra.mxu3 %v1515_v22 }
 0x105   :  { %v389_v13 = vmul.f32 %v953_v60, %v1409_v49  ;;  %v390_v14 = vmul.f32 %v953_v60, %v1415_v23  ;;  %v391_v37 = vmul.f32 %v953_v60, %v1420_v20  ;;  %631 = vmatpush.msra.mxu1 %v630_v9  ;;  %705 = vmatpush.msra.mxu2 %v1534_v15  ;;  %v954_v49 = vld [vmem:[#allocation2 + $0xa8] sm:$0xff]  ;;  %v955_v20 = vld [vmem:[#allocation2 + $0xb0] sm:$0xff]  ;;  %v648_v62 = vand.u32 4294901760, %v647_v57 }
 0x106   :  { %v653_v33 = vsub.f32 %v1565_v45, %v1655_v47  ;;  %757 = vmatpush.msrb.mxu0 %v562_v44  ;;  %v453_v60 = vadd.f32 %v452_v48, %v451_v0  ;;  %v461_v47 = vadd.f32 %v460_v30, %v459_v2  ;;  %v469_v4 = vadd.f32 %v468_v56, %v467_v52 }
 0x107   :  { %v413_v23 = vmul.f32 %v954_v49, %v389_v13  ;;  %v414_v9 = vmul.f32 %v955_v20, %v390_v14  ;;  %637 = vmatpush.msra.mxu1 %v636_v40  ;;  %708 = vmatpush.msra.mxu2 %v1565_v45  ;;  %v415_v44 = vmul.f32 %v956_v41, %v391_v37  ;;  %v446_v55 = vrot.slane %v445_v5, 1 }
 0x108   :  { %761 = vmatpush.msrb.mxu0 %v568_v36  ;;  %v654_v51 = vand.u32 4294901760, %v653_v33  ;;  %746 = vmatpush.msra.mxu3 %v1553_v7  ;;  %v454_v19 = vrot.slane %v453_v60, 1  ;;  %v462_v48 = vrot.slane %v461_v47, 1  ;;  %v470_v33 = vrot.slane %v469_v4, 1 }
 0x109   :  { %v472_v1 = vadd.f32 %v414_v9, %v413_v23  ;;  %643 = vmatpush.msra.mxu1 %v642_v59  ;;  %v1660_v59 = vld [vmem:[#allocation13_spill] sm:$0xff]  ;;  %v447_v25 = vadd.f32 %v446_v55, %v445_v5  ;;  %v1661_v56 = vand.u32 4294901760, %v1450_v43  ;;  %v1664_v57 = vand.u32 4294901760, %v1500_v32 }
 0x10a   :  { %765 = vmatpush.msrb.mxu0 %v574_v61  ;;  %v471_v6 = vadd.f32 %v470_v33, %v469_v4  ;;  %v1665_v30 = vand.u32 4294901760, %v1503_v39  ;;  %v1668_v32 = vand.u32 4294901760, %v1525_v28  ;;  %v1669_v39 = vand.u32 4294901760, %v1534_v15 }
 0x10b   :  { %v473_v40 = vadd.f32 %v472_v1, %v415_v44  ;;  %649 = vmatpush.msra.mxu1 %v648_v62  ;;  %v455_v1 = vadd.f32 %v454_v19, %v453_v60  ;;  %v509_v0 = vsel %vm508_vm2, %v447_v25, %v507_v17 }
 0x10c   :  { %769 = vmatpush.msrb.mxu0 %v580_v29  ;;  %v463_v29 = vadd.f32 %v462_v48, %v461_v47  ;;  %v1666_v47 = vand.u32 4294901760, %v1519_v38 }
 0x10d   :  { %v474_v36 = vrot.slane %v473_v40, 4  ;;  %655 = vmatpush.msra.mxu1 %v654_v51  ;;  %v511_v10 = vsel %vm510_vm3, %v455_v1, %v509_v0 }
 0x10e   :  { %773 = vmatpush.msrb.mxu0 %v586_v18  ;;  %v513_v2 = vsel %vm512_vm4, %v463_v29, %v511_v10 }
 0x10f   :  { %824 = vmatpush.msrb.mxu1 %v1660_v59  ;;  %v475_v61 = vadd.f32 %v474_v36, %v473_v40  ;;  %v515_v52 = vsel %vm514_vm5, %v471_v6, %v513_v2 }
 0x110   :  { %777 = vmatpush.msrb.mxu0 %v592_v12 }
 0x111   :  { %826 = vmatpush.msrb.mxu1 %v1346_v63  ;;  %v476_v58 = vrot.slane %v475_v61, 2  ;;  %v1662_v63 = vand.u32 4294901760, %v1458_v16 }
 0x112   :  { %781 = vmatpush.msrb.mxu0 %v1661_v56 }
 0x113   :  { %828 = vmatpush.msrb.mxu1 %v1355_v21  ;;  %v477_v18 = vadd.f32 %v476_v58, %v475_v61  ;;  %v1663_v21 = vand.u32 4294901760, %v1461_v31  ;;  %v1667_v31 = vand.u32 4294901760, %v1522_v34 }
 0x114   :  { %785 = vmatpush.msrb.mxu0 %v1662_v63 }
 0x115   :  { %830 = vmatpush.msrb.mxu1 %v1364_v8  ;;  %v478_v12 = vrot.slane %v477_v18, 1 }
 0x116   :  { %789 = vmatpush.msrb.mxu0 %v1663_v21 }
 0x117   :  { %832 = vmatpush.msrb.mxu1 %v1392_v53  ;;  %v479_v43 = vadd.f32 %v478_v12, %v477_v18 }
 0x118   :  { %793 = vmatpush.msrb.mxu0 %v1664_v57 }
 0x119   :  { %834 = vmatpush.msrb.mxu1 %v1396_v24  ;;  %v517_v8 = vsel %vm516_vm6, %v479_v43, %v515_v52 }
 0x11a   :  { %v551_v16 = vand.u32 4294901760, %v517_v8  ;;  %797 = vmatpush.msrb.mxu0 %v1665_v30 }
 0x11b   :  { %836 = vmatpush.msrb.mxu1 %v1435_v35 }
 0x11c   :  { %v552_v53 = vsub.f32 %v517_v8, %v551_v16  ;;  %801 = vmatpush.msrb.mxu0 %v1666_v47  ;;  %657 = vmatmul.f32.vlgmr.msra.gmra.mxu1 %v551_v16 }
 0x11d   :  { %838 = vmatpush.msrb.mxu1 %v1442_v11 }
 0x11e   :  { %711 = vmatmul.f32.vlgmr.msra.gmra.mxu2 %v552_v53  ;;  %v553_v24 = vand.u32 4294901760, %v552_v53  ;;  %805 = vmatpush.msrb.mxu0 %v1667_v31 }
 0x11f   :  { %840 = vmatpush.msrb.mxu1 %v1444_v3  ;;  %v1670_v3 = vand.u32 4294901760, %v1565_v45 }
 0x120   :  { %750 = vmatmul.f32.vlgmr.msra.gmra.mxu3 %v553_v24  ;;  %v554_v35 = vsub.f32 %v552_v53, %v553_v24  ;;  %809 = vmatpush.msrb.mxu0 %v1668_v32 }
 0x121   :  { %842 = vmatpush.msrb.mxu1 %v1472_v42 }
 0x122   :  { %v555_v11 = vand.u32 4294901760, %v554_v35  ;;  %813 = vmatpush.msrb.mxu0 %v1669_v39 }
 0x123   :  { %844 = vmatpush.msrb.mxu1 %v1478_v50 }
 0x124   :  { %556 = vmatmul.f32.vlgmr.msra.gmra.mxu0 %v555_v11 }
 0x125   :  { %846 = vmatpush.msrb.mxu1 %v1506_v46  ;;  %817 = vmatpush.msrb.mxu0 %v1670_v3 }
 0x127   :  { %848 = vmatpush.msrb.mxu1 %v1508_v54 }
 0x129   :  { %850 = vmatpush.msrb.mxu1 %v1510_v27 }
 0x12b   :  { %852 = vmatpush.msrb.mxu1 %v1515_v22 }
 0x12c   :  { %819 = vmatmul.f32.vlgmr.msrb.gmra.mxu0 %v551_v16 }
 0x12d   :  { %854 = vmatpush.msrb.mxu1 %v1553_v7 }
 0x12e   :  { %856 = vmatmul.f32.vlgmr.msrb.gmra.mxu1 %v551_v16 }
 0x199   :  { %v658_v42 = vpop.f32.mrf.mxu1 }
 0x1a1   :  { %v557_v50 = vpop.f32.mrf.mxu0  ;;  %v712_v34 = vpop.f32.mrf.mxu2 }
 0x1a2   :  { %v659_v38 = vadd.f32 %v658_v42, %v557_v50 }
 0x1a3   :  { %v751_v46 = vpop.f32.mrf.mxu3 }
 0x1a4   :  { %v713_v28 = vadd.f32 %v712_v34, %v659_v38 }
 0x1a6   :  { %v752_v15 = vadd.f32 %v751_v46, %v713_v28 }
 0x1a9   :  { %v820_v26 = vpop.f32.mrf.mxu0 }
 0x1aa   :  { %v821_v45 = vadd.f32 %v820_v26, %v752_v15 }
 0x1ab   :  { %v857_v13 = vpop.f32.mrf.mxu1 }
 0x1ac   :  { %v858_v14 = vadd.f32 %v857_v13, %v821_v45 }
 0x1ae   :  { %860 = vst [vmem:[#allocation8] sm:$0xff] %v858_v14 }
 0x1af   :  { %864 = vsyncadd [#allocation4], 96  ;;  %s867_s28 = sshll.u32 %s1644_s3, 4  ;;  %s1064_s29 = smov [#allocation8]   ;;  %s868_s28 = int_to_ptr.hbm [resolvable:$true] %s867_s28 }
 0x1b0   :  { %s865_s30 = sshll.u32 %s1064_s29, 4  ;;  %s1065_s4 = smov 32   ;;  %s866_s30 = int_to_ptr.vmem [resolvable:$true] %s865_s30 }
 0x1b1   :  { %s1066_s5 = smov 2  }
 0x1b2   :  { %873 = dma.vmem_to_hbm [thread:$0]  %s866_s30, 32, %s868_s28, [#allocation4], %s1065_s4, %s1065_s4, %s1066_s5  }
 0x1b3   :  { %1057 = dma.done.wait [#allocation4], 128  }
 0x1b4   :  { %1058 = vsyncadd [#allocation4], 4294967168 }
 0x1b5   :  { %878 = vsyncpa [#allocation3], 1 }
 0x1b6   :  { %879 = vsyncpa [#allocation6], 1 }
 0x1b7   :  { %880 = vsyncpa [#allocation4], 1 }

</bundles_post_ra>
